<compile_context>
chip_gen: v7x
topology: tpu7x:2x2x1
jax: 0.10.0
libtpu: 0.0.40
codegen_flags: <defaults>
</compile_context>

<pallas_src>
import numpy as np
import jax
import jax.numpy as jnp
from jax.experimental import pallas as pl
from jax.experimental.pallas import tpu as pltpu

# ---- Model hyperparameters (mirror ConvModel.__init__ defaults) -------------
NUM_FEATURES = 52      # input sequence length L; floor((L+2p-k)/s)+1 pools to L//poolSize
IN_CHANNELS  = 4
NUM_TARGETS  = 3
POOL   = 5             # poolSize
KSIZE  = 5             # kernel_size
STRIDE = 1             # stide
PAD    = 1             # padding
HIDDEN = 100

L_CONV = (NUM_FEATURES + 2 * PAD - KSIZE) // STRIDE + 1     # 50
P      = L_CONV // POOL                                      # 10
assert P == NUM_FEATURES // POOL, "pooled conv length must match Linear in_features"

CL = IN_CHANNELS * NUM_FEATURES                              # 208 (flattened input width)
TILE_N_MAX = 512                                             # batch tile (multiple of 256)


# ---- Pallas kernel: entire forward pass for one batch tile -------------------
def convmodel_kernel(x_ref, wconv_ref, bc_ref, w1_ref, b1_ref, w2_ref, b2_ref, o_ref):
    # x_ref:    (TILE_N, C*L)  flattened input tile            (VMEM, pipelined)
    # wconv_ref:(C*L, L_CONV)  banded Toeplitz conv weight     (VMEM, resident)
    # bc_ref:   (1, 1)         conv bias                       (SMEM scalar)
    # w1_ref:   (P, 100)       first linear weight (transposed, resident)
    # b1_ref:   (1, 100)
    # w2_ref:   (100, T)       second linear weight (transposed, resident)
    # b2_ref:   (1, T)
    x = x_ref[...]

    # Conv1d(in=C, out=1, k=5, stride=1, pad=1) as one MXU matmul (im2col weight).
    conv = jnp.dot(x, wconv_ref[...], preferred_element_type=jnp.float32)   # (TILE_N, 50)
    conv = jnp.maximum(conv + bc_ref[0, 0], 0.0)                            # + bias, ReLU

    # MaxPool1d(POOL): non-overlapping windows of size POOL.
    pooled = jnp.max(conv.reshape(conv.shape[0], P, POOL), axis=-1)         # (TILE_N, P)

    # Linear(P -> 100) + ReLU   (MXU, f32 accumulation)
    h1 = jnp.dot(pooled, w1_ref[...], preferred_element_type=jnp.float32) + b1_ref[...]
    h1 = jnp.maximum(h1, 0.0)

    # Linear(100 -> T) + ReLU
    out = jnp.dot(h1, w2_ref[...], preferred_element_type=jnp.float32) + b2_ref[...]
    o_ref[...] = jnp.maximum(out, 0.0)


# ---- Param preparation (one-time, outside the hot path) ---------------------
def build_conv_toeplitz(wc):
    """wc: (1, C, K) Conv1d weight  ->  (C*L, L_CONV) banded matmul weight.

    conv[n, j] = sum_{c,k} x[n, c, j*STRIDE + k - PAD] * wc[c, k]
    Taps that land in the zero-pad region are simply dropped (padding folded in),
    so the kernel consumes the *unpadded* input."""
    wc = wc.reshape(IN_CHANNELS, KSIZE)
    rows, cols, cs, ks = [], [], [], []
    for c in range(IN_CHANNELS):
        for k in range(KSIZE):
            for j in range(L_CONV):
                t = j * STRIDE + k - PAD
                if 0 <= t < NUM_FEATURES:
                    rows.append(c * NUM_FEATURES + t)
                    cols.append(j)
                    cs.append(c)
                    ks.append(k)
    w = jnp.zeros((CL, L_CONV), jnp.float32)
    return w.at[np.array(rows), np.array(cols)].set(wc[np.array(cs), np.array(ks)])


def prepare_params(params):
    """Hoist all transposes/reshapes/Toeplitz construction out of the per-call path."""
    wc, bc, w1, b1, w2, b2 = params
    return (
        build_conv_toeplitz(wc),                          # (C*L, L_CONV)
        bc.reshape(1, 1).astype(jnp.float32),             # SMEM scalar
        jnp.transpose(w1).astype(jnp.float32),            # (P, 100)
        b1.reshape(1, HIDDEN).astype(jnp.float32),
        jnp.transpose(w2).astype(jnp.float32),            # (100, T)
        b2.reshape(1, NUM_TARGETS).astype(jnp.float32),
    )


# ---- Wrapper -----------------------------------------------------------------
def conv_model_forward(x, prepared):
    """x: (N, C, L) float32, NCL like PyTorch.  Returns (N, 1, NUM_TARGETS)."""
    w_conv, bc, w1t, b1, w2t, b2 = prepared
    N = x.shape[0]
    x2d = x.reshape(N, CL)                                # contiguous -> free reshape

    # Batch tile: full batch if small (block dim == array dim is always legal),
    # else 512 rows (multiple of 256 for full MXU M-tiles on v6e/v7x).
    tile_n = N if N < TILE_N_MAX else TILE_N_MAX
    grid = (pl.cdiv(N, tile_n),)

    out = pl.pallas_call(
        convmodel_kernel,
        out_shape=jax.ShapeDtypeStruct((N, NUM_TARGETS), jnp.float32),
        grid=grid,
        in_specs=[
            pl.BlockSpec((tile_n, CL), lambda i: (i, 0)),            # input: pipelined
            pl.BlockSpec((CL, L_CONV), lambda i: (0, 0)),            # conv Toeplitz: resident
            pl.BlockSpec(memory_space=pltpu.MemorySpace.SMEM),       # conv bias scalar
            pl.BlockSpec((P, HIDDEN), lambda i: (0, 0)),             # w1^T: resident
            pl.BlockSpec((1, HIDDEN), lambda i: (0, 0)),             # b1
            pl.BlockSpec((HIDDEN, NUM_TARGETS), lambda i: (0, 0)),   # w2^T: resident
            pl.BlockSpec((1, NUM_TARGETS), lambda i: (0, 0)),        # b2
        ],
        out_specs=pl.BlockSpec((tile_n, NUM_TARGETS), lambda i: (i, 0)),
        compiler_params=pltpu.CompilerParams(
            dimension_semantics=("parallel",),            # shard batch tiles across TCs
            vmem_limit_bytes=32 * 1024 * 1024,            # explicit; safe on v7x's 64 MiB
        ),
    )(x2d, w_conv, bc, w1t, b1, w2t, b2)

    return out.reshape(N, 1, NUM_TARGETS)


# ---- Pure-JAX reference (for a correctness sanity check) ---------------------
def reference_forward(x, params):
    wc, bc, w1, b1, w2, b2 = params
    y = jax.lax.conv_general_dilated(
        x, wc, window_strides=(STRIDE,), padding=[(PAD, PAD)],
        dimension_numbers=("NCH", "OIH", "NCH"))
    y = jnp.maximum(y + bc.reshape(1, 1, 1), 0.0)                    # (N, 1, L_CONV)
    y = jnp.max(y.reshape(x.shape[0], 1, P, POOL), axis=-1)          # (N, 1, P)
    h = jnp.maximum(y @ w1.T + b1, 0.0)                              # (N, 1, 100)
    return jnp.maximum(h @ w2.T + b2, 0.0)                           # (N, 1, T)


def init_params(key):
    k1, k2, k3, k4, k5, k6 = jax.random.split(key, 6)
    wc = 0.1 * jax.random.normal(k1, (1, IN_CHANNELS, KSIZE), jnp.float32)
    bc = 0.1 * jax.random.normal(k2, (1,), jnp.float32)
    w1 = 0.1 * jax.random.normal(k3, (HIDDEN, P), jnp.float32)
    b1 = 0.1 * jax.random.normal(k4, (HIDDEN,), jnp.float32)
    w2 = 0.1 * jax.random.normal(k5, (NUM_TARGETS, HIDDEN), jnp.float32)
    b2 = 0.1 * jax.random.normal(k6, (NUM_TARGETS,), jnp.float32)
    return (wc, bc, w1, b1, w2, b2)


if __name__ == "__main__":
    key = jax.random.PRNGKey(0)
    kx, kp = jax.random.split(key)
    params = init_params(kp)
    prepared = prepare_params(params)

    # Small required case (batch=2) plus a >1-tile case with a partial last tile.
    for n in (2, 777):
        x = jax.random.normal(jax.random.fold_in(kx, n),
                              (n, IN_CHANNELS, NUM_FEATURES), jnp.float32)
        out = jax.block_until_ready(conv_model_forward(x, prepared))
        ref = jax.block_until_ready(reference_forward(x, params))
        assert out.shape == (n, 1, NUM_TARGETS), out.shape
        assert jnp.allclose(out, ref, atol=1e-4, rtol=1e-4), (
            n, float(jnp.max(jnp.abs(out - ref))))

    print("KERNEL_OK")
</pallas_src>

<mosaic_0001>
module attributes {stable_mosaic.version = 11 : i64} {
  func.func @convmodel_kernel(%arg0: i32, %arg1: memref<2x208xf32, #tpu.memory_space<vmem>>, %arg2: memref<208x50xf32, #tpu.memory_space<vmem>>, %arg3: memref<1x1xf32, #tpu.memory_space<smem>>, %arg4: memref<10x100xf32, #tpu.memory_space<vmem>>, %arg5: memref<1x100xf32, #tpu.memory_space<vmem>>, %arg6: memref<100x3xf32, #tpu.memory_space<vmem>>, %arg7: memref<1x3xf32, #tpu.memory_space<vmem>>, %arg8: memref<2x3xf32, #tpu.memory_space<vmem>>) attributes {dimension_semantics = [#tpu.dimension_semantics<parallel>], iteration_bounds = array<i64: 1>, scalar_prefetch = 0 : i64, scratch_operands = 0 : i64, tpu.core_type = #tpu.core_type<tc>, window_params = [{transform_indices = @transform_0, window_bounds = array<i64: 2, 208>}, {pipeline_mode = #tpu.pipeline_mode<synchronous>, transform_indices = @transform_1, window_bounds = array<i64: 208, 50>}, {transform_indices = @transform_2, window_bounds = array<i64: 1, 1>}, {pipeline_mode = #tpu.pipeline_mode<synchronous>, transform_indices = @transform_3, window_bounds = array<i64: 10, 100>}, {pipeline_mode = #tpu.pipeline_mode<synchronous>, transform_indices = @transform_4, window_bounds = array<i64: 1, 100>}, {pipeline_mode = #tpu.pipeline_mode<synchronous>, transform_indices = @transform_5, window_bounds = array<i64: 100, 3>}, {pipeline_mode = #tpu.pipeline_mode<synchronous>, transform_indices = @transform_6, window_bounds = array<i64: 1, 3>}, {transform_indices = @transform_7, window_bounds = array<i64: 2, 3>}]} {
    %c0 = arith.constant 0 : index
    %c0_0 = arith.constant 0 : index
    %0 = vector.load %arg1[%c0, %c0_0] : memref<2x208xf32, #tpu.memory_space<vmem>>, vector<2x208xf32>
    %c0_1 = arith.constant 0 : index
    %c0_2 = arith.constant 0 : index
    %1 = vector.load %arg2[%c0_1, %c0_2] : memref<208x50xf32, #tpu.memory_space<vmem>>, vector<208x50xf32>
    %cst = arith.constant dense<0.000000e+00> : vector<2x50xf32>
    %2 = tpu.matmul %0, %1, %cst {dimension_numbers = #tpu.dot_dimension_numbers<[1], [0], [0], [1], [0, 0, 1, 1], [], []>} : vector<2x208xf32>, vector<208x50xf32>, vector<2x50xf32> -> vector<2x50xf32>
    %c0_3 = arith.constant 0 : index
    %c0_4 = arith.constant 0 : index
    %3 = memref.load %arg3[%c0_3, %c0_4] : memref<1x1xf32, #tpu.memory_space<smem>>
    %4 = vector.broadcast %3 : f32 to vector<2x50xf32>
    %5 = arith.addf %2, %4 : vector<2x50xf32>
    %cst_5 = arith.constant 0.000000e+00 : f32
    %6 = vector.broadcast %cst_5 : f32 to vector<2x50xf32>
    %7 = arith.maximumf %5, %6 : vector<2x50xf32>
    %8 = vector.shape_cast %7 : vector<2x50xf32> to vector<2x10x5xf32>
    %cst_6 = arith.constant dense<0xFF800000> : vector<2x10xf32>
    %9 = vector.multi_reduction <maximumf>, %8, %cst_6 [2] : vector<2x10x5xf32> to vector<2x10xf32>
    %c0_7 = arith.constant 0 : index
    %c0_8 = arith.constant 0 : index
    %10 = vector.load %arg4[%c0_7, %c0_8] : memref<10x100xf32, #tpu.memory_space<vmem>>, vector<10x100xf32>
    %cst_9 = arith.constant dense<0.000000e+00> : vector<2x100xf32>
    %11 = tpu.matmul %9, %10, %cst_9 {dimension_numbers = #tpu.dot_dimension_numbers<[1], [0], [0], [1], [0, 0, 1, 1], [], []>} : vector<2x10xf32>, vector<10x100xf32>, vector<2x100xf32> -> vector<2x100xf32>
    %c0_10 = arith.constant 0 : index
    %c0_11 = arith.constant 0 : index
    %12 = vector.load %arg5[%c0_10, %c0_11] : memref<1x100xf32, #tpu.memory_space<vmem>>, vector<1x100xf32>
    %13 = vector.broadcast %12 : vector<1x100xf32> to vector<2x100xf32>
    %14 = arith.addf %11, %13 : vector<2x100xf32>
    %cst_12 = arith.constant 0.000000e+00 : f32
    %15 = vector.broadcast %cst_12 : f32 to vector<2x100xf32>
    %16 = arith.maximumf %14, %15 : vector<2x100xf32>
    %c0_13 = arith.constant 0 : index
    %c0_14 = arith.constant 0 : index
    %17 = vector.load %arg6[%c0_13, %c0_14] : memref<100x3xf32, #tpu.memory_space<vmem>>, vector<100x3xf32>
    %cst_15 = arith.constant dense<0.000000e+00> : vector<2x3xf32>
    %18 = tpu.matmul %16, %17, %cst_15 {dimension_numbers = #tpu.dot_dimension_numbers<[1], [0], [0], [1], [0, 0, 1, 1], [], []>} : vector<2x100xf32>, vector<100x3xf32>, vector<2x3xf32> -> vector<2x3xf32>
    %c0_16 = arith.constant 0 : index
    %c0_17 = arith.constant 0 : index
    %19 = vector.load %arg7[%c0_16, %c0_17] : memref<1x3xf32, #tpu.memory_space<vmem>>, vector<1x3xf32>
    %20 = vector.broadcast %19 : vector<1x3xf32> to vector<2x3xf32>
    %21 = arith.addf %18, %20 : vector<2x3xf32>
    %cst_18 = arith.constant 0.000000e+00 : f32
    %22 = vector.broadcast %cst_18 : f32 to vector<2x3xf32>
    %23 = arith.maximumf %21, %22 : vector<2x3xf32>
    %c0_19 = arith.constant 0 : index
    %c0_20 = arith.constant 0 : index
    %24 = vector.load %arg8[%c0_19, %c0_20] : memref<2x3xf32, #tpu.memory_space<vmem>>, vector<2x3xf32>
    tpu.vector_store %arg8[%c0_19, %c0_20], %23 {strides = array<i32>} : memref<2x3xf32, #tpu.memory_space<vmem>>, vector<2x3xf32>,
    return
  }
  func.func @transform_0(%arg0: i32) -> (i32, i32) {
    %c0_i32 = arith.constant 0 : i32
    %c0_i32_0 = arith.constant 0 : i32
    return %arg0, %c0_i32 : i32, i32
  }
  func.func @transform_1(%arg0: i32) -> (i32, i32) {
    %c0_i32 = arith.constant 0 : i32
    %c0_i32_0 = arith.constant 0 : i32
    %c0_i32_1 = arith.constant 0 : i32
    return %c0_i32, %c0_i32_0 : i32, i32
  }
  func.func @transform_2(%arg0: i32) -> (i32, i32) {
    %c0_i32 = arith.constant 0 : i32
    %c0_i32_0 = arith.constant 0 : i32
    %c0_i32_1 = arith.constant 0 : i32
    return %c0_i32, %c0_i32_0 : i32, i32
  }
  func.func @transform_3(%arg0: i32) -> (i32, i32) {
    %c0_i32 = arith.constant 0 : i32
    %c0_i32_0 = arith.constant 0 : i32
    %c0_i32_1 = arith.constant 0 : i32
    return %c0_i32, %c0_i32_0 : i32, i32
  }
  func.func @transform_4(%arg0: i32) -> (i32, i32) {
    %c0_i32 = arith.constant 0 : i32
    %c0_i32_0 = arith.constant 0 : i32
    %c0_i32_1 = arith.constant 0 : i32
    return %c0_i32, %c0_i32_0 : i32, i32
  }
  func.func @transform_5(%arg0: i32) -> (i32, i32) {
    %c0_i32 = arith.constant 0 : i32
    %c0_i32_0 = arith.constant 0 : i32
    %c0_i32_1 = arith.constant 0 : i32
    return %c0_i32, %c0_i32_0 : i32, i32
  }
  func.func @transform_6(%arg0: i32) -> (i32, i32) {
    %c0_i32 = arith.constant 0 : i32
    %c0_i32_0 = arith.constant 0 : i32
    %c0_i32_1 = arith.constant 0 : i32
    return %c0_i32, %c0_i32_0 : i32, i32
  }
  func.func @transform_7(%arg0: i32) -> (i32, i32) {
    %c0_i32 = arith.constant 0 : i32
    %c0_i32_0 = arith.constant 0 : i32
    return %arg0, %c0_i32 : i32, i32
  }
}

</mosaic_0001>

<bundles_post_ra>
// kernel: tpu_custom_call.1
= control target key start
LH: loop header
LB: loop body
LE: loop exit
PB: predicated region body
PF: predicated region fallthrough
CT: control target
= control target key end

     0   :  { %v634_v3 = vmov 0.0|0.0   ;;  %vm67_vm0 = vcmask 654336   ;;  %s863_s0 = inlined_call_operand.vmem [shape: f32[2,208], index: 0, kind: input, shape index: {}]   ;;  %s864_s1 = inlined_call_operand.vmem [shape: f32[208,50], index: 1, kind: input, shape index: {}]   ;;  %s865_s2 = inlined_call_operand.<no memory space> [shape: f32[1,1], index: 2, kind: input, shape index: {}]   ;;  %s866_s3 = inlined_call_operand.vmem [shape: f32[10,100], index: 3, kind: input, shape index: {}]   ;;  %s867_s4 = inlined_call_operand.vmem [shape: f32[1,100], index: 4, kind: input, shape index: {}]   ;;  %s868_s5 = inlined_call_operand.vmem [shape: f32[100,3], index: 5, kind: input, shape index: {}]   ;;  %s869_s6 = inlined_call_operand.vmem [shape: f32[1,3], index: 6, kind: input, shape index: {}]   ;;  %s870_s7 = inlined_call_operand.hbm [shape: f32[2,3], index: 7, kind: output, shape index: {}]  }
   0x1   :  { %v29_v0 = vld [vmem:[%s864_s1] sm:$0xff]  ;;  %v30_v1 = vld [vmem:[%s864_s1 + $0x8] sm:$0xff]  ;;  %v31_v2 = vld [vmem:[%s864_s1 + $0x10] sm:$0xff]  ;;  %533 = vmatprep.subr.bf16.mxu0 %v634_v3  ;;  %572 = vmatprep.subr.bf16.mxu1 %v634_v3 }
   0x2   :  { %v534_v4 = vpack.c.bf16 %v30_v1, %v29_v0  ;;  %v32_v5 = vld [vmem:[%s864_s1 + $0x18] sm:$0xff]  ;;  %v33_v7 = vld [vmem:[%s864_s1 + $0x20] sm:$0xff]  ;;  %v34_v8 = vld [vmem:[%s864_s1 + $0x28] sm:$0xff] }
   0x3   :  { %v537_v6 = vpack.c.bf16 %v32_v5, %v31_v2  ;;  %v540_v9 = vpack.c.bf16 %v34_v8, %v33_v7  ;;  %v35_v10 = vld [vmem:[%s864_s1 + $0x30] sm:$0xff]  ;;  %v36_v11 = vld [vmem:[%s864_s1 + $0x38] sm:$0xff]  ;;  %v472_v12 = vld.sshfl [vmem:[%s863_s0] sm:$0x33 pattern:$0x76325410] }
   0x4   :  { %535 = vmatpush1.bf16.msra.mxu0 %v534_v4  ;;  %v65_v13 = vcombine.high %v472_v12, %v472_v12 }
   0x5   :  { %536 = vmatprep.subr.bf16.mxu0 %v634_v3 }
   0x8   :  { %538 = vmatpush1.bf16.msra.mxu0 %v537_v6 }
   0x9   :  { %539 = vmatprep.subr.bf16.mxu0 %v634_v3 }
   0xa   :  { %13 = vsyncpa [#allocation4], 0  ;;  %v543_v14 = vpack.c.bf16 %v36_v11, %v35_v10  ;;  %473 = vmatprep.mubr.msk.f32.mxu0 %vm67_vm0, %v65_v13  ;;  %v37_v15 = vld [vmem:[%s864_s1 + $0x40] sm:$0xff]  ;;  %v38_v16 = vld [vmem:[%s864_s1 + $0x48] sm:$0xff]  ;;  %v56_v42 = vstv %s865_s2  ;;  %s635_s9 = smov 113   ;;  %s636_s10 = smov 123   ;;  %v171_v51 = vlaneseq }
   0xb   :  { %v546_v17 = vpack.c.bf16 %v38_v16, %v37_v15  ;;  %v39_v18 = vld [vmem:[%s864_s1 + $0x50] sm:$0xff]  ;;  %v40_v19 = vld [vmem:[%s864_s1 + $0x58] sm:$0xff]  ;;  %v41_v21 = vld [vmem:[%s864_s1 + $0x60] sm:$0xff]  ;;  %s637_s11 = smov 108   ;;  %s639_s12 = smov 98   ;;  %vm232_vm1 = vcmask 33792  }
   0xc   :  { %541 = vmatpush1.bf16.msra.mxu0 %v540_v9  ;;  %v549_v20 = vpack.c.bf16 %v40_v19, %v39_v18  ;;  %v42_v22 = vld [vmem:[%s864_s1 + $0x68] sm:$0xff]  ;;  %v43_v24 = vld [vmem:[%s864_s1 + $0x70] sm:$0xff]  ;;  %v44_v25 = vld [vmem:[%s864_s1 + $0x78] sm:$0xff]  ;;  %s640_s13 = smov 103   ;;  %s641_s14 = smov 88   ;;  %v172_v55 = vshrl.u32 %v171_v51, 7 }
   0xd   :  { %542 = vmatprep.subr.bf16.mxu0 %v634_v3  ;;  %v552_v23 = vpack.c.bf16 %v42_v22, %v41_v21  ;;  %v555_v26 = vpack.c.bf16 %v44_v25, %v43_v24  ;;  %v45_v27 = vld [vmem:[%s864_s1 + $0x80] sm:$0xff]  ;;  %v46_v28 = vld [vmem:[%s864_s1 + $0x88] sm:$0xff]  ;;  %v47_v30 = vld [vmem:[%s864_s1 + $0x90] sm:$0xff]  ;;  %s642_s15 = smov 93   ;;  %s643_s2 = smov 83   ;;  %vm228_vm2 = vcmask 39936  }
   0xe   :  { %v558_v29 = vpack.c.bf16 %v46_v28, %v45_v27  ;;  %v48_v31 = vld [vmem:[%s864_s1 + $0x98] sm:$0xff]  ;;  %v49_v33 = vld [vmem:[%s864_s1 + $0xa0] sm:$0xff]  ;;  %v50_v34 = vld [vmem:[%s864_s1 + $0xa8] sm:$0xff]  ;;  %v644_v49 = vmov 1983009808   ;;  %v646_v21 = vmov 0.0  }
   0xf   :  { %v561_v32 = vpack.c.bf16 %v48_v31, %v47_v30  ;;  %v564_v35 = vpack.c.bf16 %v50_v34, %v49_v33  ;;  %v51_v36 = vld [vmem:[%s864_s1 + $0xb0] sm:$0xff]  ;;  %v52_v37 = vld [vmem:[%s864_s1 + $0xb8] sm:$0xff]  ;;  %v53_v39 = vld [vmem:[%s864_s1 + $0xc0] sm:$0xff]  ;;  %v169_v50 = vunpack.c.l.s4 %v644_v49  ;;  %v645_v57 = vmov 1934713408   ;;  %s649_s22 = smov [#allocation3]  }
  0x10   :  { %544 = vmatpush1.bf16.msra.mxu0 %v543_v14  ;;  %v567_v38 = vpack.c.bf16 %v52_v37, %v51_v36  ;;  %v54_v40 = vld [vmem:[%s864_s1 + $0xc8] sm:$0xff]  ;;  %s638_s1 = smov 118   ;;  %v201_v58 = vunpack.c.l.s4 %v645_v57  ;;  %v242_v25 = vld [vmem:[%s866_s3] sm:$0xff]  ;;  %vm282_vm3 = vcmask 1041408   ;;  %vm647_vm4 = vmmov 1   ;;  %s464_s0 = sshll.u32 %s649_s22, 4  ;;  %s465_s0 = int_to_ptr.vmem [resolvable:$true] %s464_s0 }
  0x11   :  { %545 = vmatprep.subr.bf16.mxu0 %v634_v3  ;;  %v570_v41 = vpack.c.bf16 %v54_v40, %v53_v39  ;;  %v170_v54 = vunpack.c.0.s8 %v169_v50  ;;  %vm574_vm5 = vmpackc.low %vm282_vm3, %vm647_vm4  ;;  %vm648_vm6 = vmmov 0   ;;  %v256_v28 = vand.u32 127, %v171_v51  ;;  %v357_v36 = vld [vmem:[%s868_s5] sm:$0xff]  ;;  %v358_v37 = vld [vmem:[%s868_s5 + $0x8] sm:$0xff]  ;;  %p615_p1 = scmp.lt.s32.totalorder %s465_s0, %s465_s0 }
  0x12   :  { %v202_v1 = vunpack.c.0.s8 %v201_v58  ;;  %501 = vmatprep.mubr.msk.f32.mxu1 %vm648_vm6, %v646_v21  ;;  %vm266_vm7 = vcmask 130112   ;;  %vm277_vm8 = vcmask 1041409   ;;  %vm279_vm9 = vcmask 80896   ;;  %v361_v49 = vld [vmem:[%s868_s5 + $0x20] sm:$0xff]  ;;  %v362_v50 = vld [vmem:[%s868_s5 + $0x28] sm:$0xff]  ;;  %v367_v58 = vld [vmem:[%s868_s5 + $0x50] sm:$0xff] }
  0x13   :  { %v173_v61 = vsub.s32 %v170_v54, %v172_v55  ;;  %v259_v31 = vsub.s32 %v256_v28, %v172_v55  ;;  %v583_v51 = vpack.c.bf16 %v362_v50, %v361_v49  ;;  %vm381_vm10 = vcmask 1043456  }
  0x14   :  { %547 = vmatpush1.bf16.msra.mxu0 %v546_v17  ;;  %v205_v9 = vsub.s32 %v202_v1, %v172_v55  ;;  %vm377_vm11 = vcmask 818176   ;;  %vm456_vm12 = vcmask 17408  }
  0x15   :  { %548 = vmatprep.subr.bf16.mxu0 %v634_v3 }
  0x18   :  { %550 = vmatpush1.bf16.msra.mxu0 %v549_v20 }
  0x19   :  { %551 = vmatprep.subr.bf16.mxu0 %v634_v3 }
  0x1c   :  { %553 = vmatpush1.bf16.msra.mxu0 %v552_v23 }
  0x1d   :  { %554 = vmatprep.subr.bf16.mxu0 %v634_v3 }
  0x20   :  { %556 = vmatpush1.bf16.msra.mxu0 %v555_v26  ;;  %v243_v26 = vld [vmem:[%s866_s3 + $0x8] sm:$0x3] }
  0x21   :  { %557 = vmatprep.subr.bf16.mxu0 %v634_v3  ;;  %v573_v27 = vpack.c.bf16 %v243_v26, %v242_v25 }
  0x23   :  { %575 = vmatpush3.bf16.msk.msra.mxu1 %vm574_vm5, %v573_v27 }
  0x24   :  { %559 = vmatpush1.bf16.msra.mxu0 %v558_v29  ;;  %576 = vmatprep.subr.bf16.mxu1 %v634_v3  ;;  %v261_v29 = vadd.s32 4294967288, %v256_v28 }
  0x25   :  { %560 = vmatprep.subr.bf16.mxu0 %v634_v3 }
  0x26   :  { %v264_v33 = vsub.s32 %v261_v29, %v172_v55  ;;  %v365_v55 = vld [vmem:[%s868_s5 + $0x40] sm:$0xff] }
  0x28   :  { %562 = vmatpush1.bf16.msra.mxu0 %v561_v32 }
  0x29   :  { %563 = vmatprep.subr.bf16.mxu0 %v634_v3 }
  0x2c   :  { %565 = vmatpush1.bf16.msra.mxu0 %v564_v35 }
  0x2d   :  { %566 = vmatprep.subr.bf16.mxu0 %v634_v3 }
  0x30   :  { %568 = vmatpush1.bf16.msra.mxu0 %v567_v38 }
  0x31   :  { %569 = vmatprep.subr.bf16.mxu0 %v634_v3 }
  0x34   :  { %571 = vmatpush1.bf16.msra.mxu0 %v570_v41 }
  0x37   :  { %135 = vmatmul.mubr.f32.vlgmr.msra.gmra.mrb[0].mxu0 %v472_v12 }
 0x10a   :  { %v136_v43 = vpop.f32.mrb[0].mxu0 }
 0x10b   :  { %v137_v44 = vadd.f32 %v136_v43, %v56_v42  ;;  %v138_v45 = vpop.f32.mrb[1].mxu0  ;;  %v577_v42 = vpack.c.bf16 %v358_v37, %v357_v36 }
 0x10c   :  { %v359_v45 = vld [vmem:[%s868_s5 + $0x10] sm:$0xff] }
 0x10d   :  { %v140_v46 = vmax.f32 %v137_v44, 0.0 }
 0x10f   :  { %148 = vrot.lane.b32.xlu1 %v140_v46, %s635_s9  ;;  %142 = vrot.lane.b32.xlu0 %v140_v46, %s636_s10 }
 0x113   :  { %151 = vrot.lane.b32.xlu1 %v140_v46, %s637_s11  ;;  %145 = vrot.lane.b32.xlu0 %v140_v46, %s638_s1 }
 0x117   :  { %157 = vrot.lane.b32.xlu1 %v140_v46, %s639_s12  ;;  %154 = vrot.lane.b32.xlu0 %v140_v46, %s640_s13 }
 0x11b   :  { %163 = vrot.lane.b32.xlu1 %v140_v46, %s641_s14  ;;  %160 = vrot.lane.b32.xlu0 %v140_v46, %s642_s15 }
 0x11f   :  { %165 = vrot.lane.b32.xlu0 %v140_v46, %s643_s2 }
 0x181   :  { %v149_v47 = vpop.permute.xlu1 %148  ;;  %v143_v48 = vpop.permute.xlu0 %142 }
 0x182   :  { %v175_v62 = vcombine.low %v143_v48, %v149_v47 }
 0x184   :  { %v182_v4 = vrot.slane %v175_v62, %v173_v61 }
 0x185   :  { %v152_v52 = vpop.permute.xlu1 %151  ;;  %v146_v53 = vpop.permute.xlu0 %145 }
 0x186   :  { %v167_v56 = vcombine.low %v140_v46, %v146_v53  ;;  %v360_v46 = vld [vmem:[%s868_s5 + $0x18] sm:$0xff] }
 0x187   :  { %v580_v48 = vpack.c.bf16 %v360_v46, %v359_v45  ;;  %v364_v53 = vld [vmem:[%s868_s5 + $0x38] sm:$0xff] }
 0x188   :  { %v174_v63 = vrot.slane %v167_v56, %v173_v61  ;;  %v366_v56 = vld [vmem:[%s868_s5 + $0x48] sm:$0xff] }
 0x189   :  { %v158_v59 = vpop.permute.xlu1 %157  ;;  %v155_v60 = vpop.permute.xlu0 %154  ;;  %v589_v57 = vpack.c.bf16 %v366_v56, %v365_v55 }
 0x18a   :  { %v183_v0 = vcombine.low %v152_v52, %v158_v59  ;;  %v199_v6 = vcombine.low %v174_v63, %v182_v4  ;;  %v363_v52 = vld [vmem:[%s868_s5 + $0x30] sm:$0xff]  ;;  %v368_v59 = vld [vmem:[%s868_s5 + $0x58] sm:$0xff] }
 0x18b   :  { %v586_v54 = vpack.c.bf16 %v364_v53, %v363_v52 }
 0x18c   :  { %v190_v7 = vrot.slane %v183_v0, %v173_v61  ;;  %v206_v15 = vrot.slane %v199_v6, %v205_v9 }
 0x18d   :  { %v161_v2 = vpop.permute.xlu0 %160  ;;  %v164_v10 = vpop.permute.xlu1 %163 }
 0x18e   :  { %v191_v5 = vcombine.low %v155_v60, %v161_v2  ;;  %v592_v60 = vpack.c.bf16 %v368_v59, %v367_v58  ;;  %v477_v2 = vld [vmem:[%s869_s6] ss:$0 sm:$0xff] }
 0x190   :  { %v198_v8 = vrot.slane %v191_v5, %v173_v61  ;;  %v369_v61 = vld [vmem:[%s868_s5 + $0x60] sm:$0xf] }
 0x191   :  { %v166_v11 = vpop.permute.xlu0 %165 }
 0x192   :  { %v207_v12 = vcombine.low %v190_v7, %v198_v8  ;;  %v219_v13 = vcombine.low %v164_v10, %v166_v11 }
 0x194   :  { %v226_v14 = vrot.slane %v219_v13, %v205_v9  ;;  %v214_v16 = vrot.slane %v207_v12, %v205_v9 }
 0x196   :  { %v233_v17 = vsel %vm232_vm1, %v226_v14, -inf  ;;  %v215_v18 = vcombine.low %v206_v15, %v214_v16  ;;  %v216_v19 = vcombine.high %v206_v15, %v214_v16  ;;  %v227_v22 = vcombine.high %v226_v14, %v646_v21 }
 0x197   :  { %234 = vmax.xlane.f32.xlu0 %v233_v17 }
 0x198   :  { %v229_v20 = vsel %vm228_vm2, %v215_v18, -inf  ;;  %v236_v23 = vsel %vm228_vm2, %v216_v19, -inf  ;;  %v239_v24 = vsel %vm232_vm1, %v227_v22, -inf }
 0x199   :  { %230 = vmax.xlane.f32.xlu1 %v229_v20 }
 0x19b   :  { %237 = vmax.xlane.f32.xlu0 %v236_v23 }
 0x19d   :  { %240 = vmax.xlane.f32.xlu1 %v239_v24 }
 0x224   :  { %v235_v30 = vpop.xlane.xlu0 %234 }
 0x225   :  { %v265_v39 = vrot.slane %v235_v30, %v264_v33 }
 0x226   :  { %v231_v32 = vpop.xlane.xlu1 %230 }
 0x227   :  { %v260_v35 = vrot.slane %v231_v32, %v259_v31 }
 0x228   :  { %v238_v34 = vpop.xlane.xlu0 %237 }
 0x229   :  { %v271_v40 = vrot.slane %v238_v34, %v259_v31  ;;  %v267_v43 = vsel %vm266_vm7, %v265_v39, %v260_v35 }
 0x22a   :  { %v241_v38 = vpop.xlane.xlu1 %240 }
 0x22b   :  { %v275_v41 = vrot.slane %v241_v38, %v264_v33 }
 0x22d   :  { %v276_v44 = vsel %vm266_vm7, %v275_v41, %v271_v40 }
 0x22e   :  { %v278_v47 = vsel %vm277_vm8, %v276_v44, %v267_v43 }
 0x22f   :  { %502 = vmatmul.mubr.msk.f32.vlgmr.msra.gmra.mrb[0].mxu1 %vm279_vm9, %v278_v47 }
 0x230   :  { %578 = vmatpush3.bf16.msra.mxu1 %v577_v42  ;;  %530 = vmatprep.mubr.msk.f32.mxu1 %vm648_vm6, %v646_v21 }
 0x231   :  { %579 = vmatprep.subr.bf16.mxu1 %v634_v3 }
 0x234   :  { %581 = vmatpush3.bf16.msra.mxu1 %v580_v48 }
 0x235   :  { %582 = vmatprep.subr.bf16.mxu1 %v634_v3 }
 0x238   :  { %584 = vmatpush3.bf16.msra.mxu1 %v583_v51 }
 0x239   :  { %585 = vmatprep.subr.bf16.mxu1 %v634_v3 }
 0x23c   :  { %587 = vmatpush3.bf16.msra.mxu1 %v586_v54 }
 0x23d   :  { %588 = vmatprep.subr.bf16.mxu1 %v634_v3 }
 0x240   :  { %590 = vmatpush3.bf16.msra.mxu1 %v589_v57 }
 0x241   :  { %591 = vmatprep.subr.bf16.mxu1 %v634_v3  ;;  %v474_v3 = vld [vmem:[%s867_s4] ss:$0 sm:$0xff]  ;;  %s610_s4 = scalar_lea.vmem %s465_s0, 32 }
 0x242   :  { %p611_p0 = scmp.ne.s32.totalorder %s465_s0, %s610_s4  ;;  %p616_p2 = scmp.lt.s32.totalorder %s610_s4, %s610_s4 }
 0x244   :  { %593 = vmatpush3.bf16.msra.mxu1 %v592_v60  ;;  %p617_p3 = por %p616_p2, %p615_p1 }
 0x245   :  { %528 = vmatprep.subr.mxu1 %v646_v21 }
 0x246   :  { %p618_p4 = pnand %p617_p3, %p611_p0 }
 0x248   :  { %529 = vmatpush3.msk.msra.mxu1 %vm381_vm10, %v369_v61 }
 0x302   :  { %v352_v62 = vpop.f32.mrb[0].mxu1 }
 0x303   :  { %v353_v63 = vadd.f32 %v474_v3, %v352_v62  ;;  %v503_v0 = vpop.f32.mrb[1].mxu1 }
 0x305   :  { %v356_v1 = vmax.f32 %v353_v63, 0.0 }
 0x307   :  { %531 = vmatmul.mubr.msk.f32.vlgmr.msra.gmra.mrb[2].mxu1 %vm377_vm11, %v356_v1 }
 0x3da   :  { %v451_v4 = vpop.f32.mrb[2].mxu1 }
 0x3db   :  { %v452_v5 = vadd.f32 %v477_v2, %v451_v4  ;;  %v532_v6 = vpop.f32.mrb[3].mxu1 }
 0x3dd   :  { %v455_v7 = vmax.f32 %v452_v5, 0.0 }
 0x3df   :  { %457 = vst.msk [vmem:[#allocation3] sm:$0x3] %vm456_vm12, %v455_v7 }
 0x3e0   :  { %621 = shalt.err (!%p618_p4)
}
 0x3e1   :  { %s622_s6 = scalar_lea.hbm %s870_s7, 32 }
 0x3e2   :  { %p623_p5 = scmp.ne.s32.totalorder %s870_s7, %s622_s6  ;;  %p626_p6 = scmp.lt.u32.totalorder %s622_s6, %s870_s7 }
 0x3e4   :  { %p628_p7 = pnand %p626_p6, %p623_p5 }
 0x3e6   :  { %631 = shalt.err (!%p628_p7)
}
 0x3e7   :  { %467 = dma.vmem_to_hbm [thread:$0]  %s465_s0, 32, %s870_s7, [#allocation4]  }
 0x3e8   :  { %632 = dma.done.wait [#allocation4], 32  }
 0x3e9   :  { %633 = vsyncadd [#allocation4], 4294967264 }
 0x3ea   :  { %471 = vsyncpa [#allocation4], 1 }

</bundles_post_ra>
